<compile_context>
chip_gen: v7x
topology: tpu7x:2x2x1
jax: 0.10.0
libtpu: 0.0.40
codegen_flags: <defaults>
</compile_context>

<pallas_src>
import functools

import jax
import jax.numpy as jnp
from jax.experimental import pallas as pl
from jax.experimental.pallas import tpu as pltpu

_INV_SQRT2 = 0.7071067811865476
_SQRT_2_OVER_PI = 0.7978845608028654


def _round_up(a, m):
    return ((a + m - 1) // m) * m


def _cdiv(a, b):
    return -(-a // b)


def _gelu_f32(h, exact):
    if exact:
        # exact erf GELU (torch.nn.GELU default) -- long VALU polynomial
        return 0.5 * h * (1.0 + jax.lax.erf(h * _INV_SQRT2))
    # tanh approximation: the transcendental runs on the otherwise-idle EUP
    # slot.  Deviation from exact erf GELU is far below bf16 matmul noise.
    return 0.5 * h * (1.0 + jnp.tanh(_SQRT_2_OVER_PI * (h + 0.044715 * h * h * h)))


# --------------------------------------------------------------------------
# Kernels
# --------------------------------------------------------------------------
def _mlp_kernel_resident(x_ref, w1_ref, b1_ref, w2_ref, b2_ref, o_ref, *,
                         exact_gelu):
    """Grid = (row tiles,).  Full H resident in VMEM; no accumulator needed."""
    h = jnp.dot(x_ref[...], w1_ref[...], preferred_element_type=jnp.float32)
    h = _gelu_f32(h + b1_ref[...], exact_gelu)
    y = jnp.dot(h.astype(w2_ref.dtype), w2_ref[...],
                preferred_element_type=jnp.float32)
    o_ref[...] = (y + b2_ref[...]).astype(o_ref.dtype)


def _mlp_kernel_chunked(x_ref, w1_ref, b1_ref, w2_ref, b2_ref, o_ref, acc_ref,
                        *, exact_gelu):
    """Grid = (row tiles, hidden chunks).  acc_ref: f32 (tile_m, O_pad)."""
    k = pl.program_id(1)

    @pl.when(k == 0)
    def _():
        acc_ref[...] = jnp.zeros_like(acc_ref)

    h = jnp.dot(x_ref[...], w1_ref[...], preferred_element_type=jnp.float32)
    h = _gelu_f32(h + b1_ref[...], exact_gelu)
    acc_ref[...] += jnp.dot(h.astype(w2_ref.dtype), w2_ref[...],
                            preferred_element_type=jnp.float32)

    @pl.when(k == pl.num_programs(1) - 1)
    def _():
        o_ref[...] = (acc_ref[...] + b2_ref[...]).astype(o_ref.dtype)


# --------------------------------------------------------------------------
# VMEM accounting & tile planning
# --------------------------------------------------------------------------
def _vmem_need_bytes(tile_m, tile_h, C, O_pad, out_bytes, resident, wbuf=2):
    b = 0
    b += 2 * tile_m * C * 2              # x row tile (double-buffered bf16)
    b += wbuf * C * tile_h * 2           # fc1 weight
    b += wbuf * tile_h * 4               # fc1 bias (f32)
    b += wbuf * tile_h * O_pad * 2       # fc2 weight
    b += 2 * O_pad * 4                   # fc2 bias (f32)
    b += 2 * tile_m * O_pad * out_bytes  # output tile (double-buffered)
    if not resident:
        b += tile_m * O_pad * 4          # f32 accumulator scratch
    b += tile_m * tile_h * 4             # in-kernel f32 fc1/GELU intermediate
    b += tile_m * tile_h * 2             # bf16 re-cast of GELU output
    return b


def _plan_tiles(M, C, H, O_pad, out_bytes, budget, tile_m_target):
    M8 = _round_up(M, 8)
    tm_start = max(8, min(_round_up(tile_m_target, 8), M8))

    def shrink(tm):
        return max(8, _round_up(tm // 2, 8))

    # 1) Prefer full fc1/fc2 residency (grid k-dim == 1): weights become a
    #    one-time DMA instead of being re-streamed for every row tile.
    floor_res = max(8, min(128, M8))
    tm = tm_start
    while True:
        if _vmem_need_bytes(tm, H, C, O_pad, out_bytes, resident=True) <= budget:
            return tm, H, True
        if tm <= floor_res:
            break
        tm = max(floor_res, shrink(tm))

    # 2) Fall back to chunking H.  Shrink tile_h first, tile_m last.
    tm = tm_start
    while True:
        th = _round_up(min(H, 2048), 128)
        while th >= 128:
            if _vmem_need_bytes(tm, th, C, O_pad, out_bytes,
                                resident=False) <= budget:
                return tm, th, False
            th -= 128
        if tm <= 8:
            break
        tm = shrink(tm)
    return 8, 128, False


# --------------------------------------------------------------------------
# Wrapper
# --------------------------------------------------------------------------
def mlp_pallas(x, w1, b1, w2, b2, *, tile_m=512, exact_gelu=False,
               compute_dtype=jnp.bfloat16, out_dtype=None,
               vmem_budget_bytes=44 * 1024 * 1024,
               single_buffer_weights=False):
    """x: (B, N, C).  w1: (C, H), b1: (H,), w2: (H, O), b2: (O,)."""
    B, N, C = x.shape
    H = w1.shape[1]
    O = w2.shape[1]
    M = B * N
    out_dtype = out_dtype or x.dtype
    out_bytes = jnp.dtype(out_dtype).itemsize

    # Lane-dense output: pad O to a multiple of 128 (unmasked stores).
    O_pad = _round_up(O, 128)

    tile_m, tile_h, resident = _plan_tiles(
        M, C, H, O_pad, out_bytes, vmem_budget_bytes, tile_m)

    # Megacore (v7x, 2 TCs): keep the number of row tiles even when > 1.
    n_row = _cdiv(M, tile_m)
    if n_row > 1 and n_row % 2 == 1:
        tile_m = max(8, _round_up(_cdiv(M, n_row + 1), 8))

    M_pad = _round_up(M, tile_m)
    H_pad = H if resident else _round_up(H, tile_h)

    # ---- host-side padding (zero pads are numerically inert; padded M rows
    # ---- produce garbage that is sliced off below) -----------------------
    x2d = x.reshape(M, C)
    if M_pad != M:
        x2d = jnp.pad(x2d, ((0, M_pad - M), (0, 0)))
    if H_pad != H:
        w1 = jnp.pad(w1, ((0, 0), (0, H_pad - H)))
        b1 = jnp.pad(b1, ((0, H_pad - H),))
        w2 = jnp.pad(w2, ((0, H_pad - H), (0, 0)))
    if O_pad != O:
        w2 = jnp.pad(w2, ((0, 0), (0, O_pad - O)))
        b2 = jnp.pad(b2, ((0, O_pad - O),))

    # bf16 MXU path for matmul operands; biases / accum / GELU stay f32.
    x2d = x2d.astype(compute_dtype)
    w1c = w1.astype(compute_dtype)
    w2c = w2.astype(compute_dtype)
    b1_2d = b1.reshape(1, H_pad).astype(jnp.float32)
    b2_2d = b2.reshape(1, O_pad).astype(jnp.float32)

    # Explicit VMEM limit (raises the 16/32 MiB scoped defaults, stays under
    # v7x's 64 MiB physical).
    need = _vmem_need_bytes(tile_m, tile_h, C, O_pad, out_bytes, resident)
    vmem_limit = int(min(max(need + (8 << 20), 32 << 20), 56 << 20))

    flops = 2 * M_pad * H_pad * (C + O_pad)
    transc = M_pad * H_pad
    bytes_accessed = (x2d.size * 2 + w1c.size * 2 + w2c.size * 2
                      + b1_2d.size * 4 + b2_2d.size * 4
                      + M_pad * O_pad * out_bytes)
    cost = pl.CostEstimate(flops=int(flops), transcendentals=int(transc),
                           bytes_accessed=int(bytes_accessed))

    if resident:
        # Weights are grid-invariant here; Buffered(1) reclaims their
        # double-buffer (most valuable on v7x) -- opt-in, see TODO above.
        w_pipe = dict(pipeline_mode=pl.Buffered(1)) if single_buffer_weights else {}
        kernel = functools.partial(_mlp_kernel_resident, exact_gelu=exact_gelu)
        grid = (M_pad // tile_m,)
        in_specs = [
            pl.BlockSpec((tile_m, C), lambda i: (i, 0)),          # x row tile
            pl.BlockSpec((C, H_pad), lambda i: (0, 0), **w_pipe),  # fc1 W
            pl.BlockSpec((1, H_pad), lambda i: (0, 0), **w_pipe),  # fc1 b
            pl.BlockSpec((H_pad, O_pad), lambda i: (0, 0), **w_pipe),  # fc2 W
            pl.BlockSpec((1, O_pad), lambda i: (0, 0), **w_pipe),  # fc2 b
        ]
        out_specs = pl.BlockSpec((tile_m, O_pad), lambda i: (i, 0))
        scratch = []
        dims = ("parallel",)
    else:
        kernel = functools.partial(_mlp_kernel_chunked, exact_gelu=exact_gelu)
        grid = (M_pad // tile_m, H_pad // tile_h)
        in_specs = [
            pl.BlockSpec((tile_m, C), lambda i, k: (i, 0)),     # x row tile
            pl.BlockSpec((C, tile_h), lambda i, k: (0, k)),     # fc1 W chunk
            pl.BlockSpec((1, tile_h), lambda i, k: (0, k)),     # fc1 b chunk
            pl.BlockSpec((tile_h, O_pad), lambda i, k: (k, 0)),  # fc2 W chunk
            pl.BlockSpec((1, O_pad), lambda i, k: (0, 0)),      # fc2 b
        ]
        out_specs = pl.BlockSpec((tile_m, O_pad), lambda i, k: (i, 0))
        scratch = [pltpu.VMEM((tile_m, O_pad), jnp.float32)]
        dims = ("parallel", "arbitrary")

    out2d = pl.pallas_call(
        kernel,
        out_shape=jax.ShapeDtypeStruct((M_pad, O_pad), out_dtype),
        grid_spec=pltpu.PrefetchScalarGridSpec(
            num_scalar_prefetch=0,
            grid=grid,
            in_specs=in_specs,
            out_specs=out_specs,
            scratch_shapes=scratch,
        ),
        compiler_params=pltpu.CompilerParams(
            dimension_semantics=dims,
            vmem_limit_bytes=vmem_limit,
        ),
        cost_estimate=cost,
    )(x2d, w1c, b1_2d, w2c, b2_2d)

    # Padded rows / output lanes are sliced off (keeps correctness).
    return out2d[:M, :O].reshape(B, N, O)


# --------------------------------------------------------------------------
# Pure-JAX reference (exact erf GELU, f32)
# --------------------------------------------------------------------------
def mlp_reference(x, w1, b1, w2, b2):
    h = jnp.einsum("bnc,ch->bnh", x, w1) + b1
    h = 0.5 * h * (1.0 + jax.lax.erf(h / jnp.sqrt(2.0)))
    return jnp.einsum("bnh,ho->bno", h, w2) + b2


if __name__ == "__main__":
    key = jax.random.PRNGKey(0)

    def make_case(k, B, N, C, HID, OUT):
        kx, k1, kb1, k2, kb2 = jax.random.split(k, 5)
        x = jax.random.normal(kx, (B, N, C), dtype=jnp.float32)
        w1 = jax.random.normal(k1, (C, HID), dtype=jnp.float32) * 0.05
        b1 = jax.random.normal(kb1, (HID,), dtype=jnp.float32) * 0.02
        w2 = jax.random.normal(k2, (HID, OUT), dtype=jnp.float32) * 0.05
        b2 = jax.random.normal(kb2, (OUT,), dtype=jnp.float32) * 0.02
        return x, w1, b1, w2, b2

    # Case 1: small shapes consistent with a PVT MLP block (B=2, N=8 tokens,
    # C=16, hidden=32, out=in).
    k1, k2 = jax.random.split(key)
    x, w1, b1, w2, b2 = make_case(k1, B=2, N=8, C=16, HID=32, OUT=16)
    y = jax.block_until_ready(mlp_pallas(x, w1, b1, w2, b2))
    y_ref = mlp_reference(x, w1, b1, w2, b2)
    assert y.shape == y_ref.shape
    assert jnp.allclose(y, y_ref, atol=2e-2, rtol=2e-2), "case-1 mismatch"

    # Case 2: exercises M padding (N not multiple of 8) and O < 128 lane
    # padding, still tiny.
    x, w1, b1, w2, b2 = make_case(k2, B=2, N=50, C=64, HID=128, OUT=64)
    y = jax.block_until_ready(mlp_pallas(x, w1, b1, w2, b2))
    y_ref = mlp_reference(x, w1, b1, w2, b2)
    assert y.shape == y_ref.shape
    assert jnp.allclose(y, y_ref, atol=2e-2, rtol=2e-2), "case-2 mismatch"

    print("KERNEL_OK")
</pallas_src>

<mosaic_0001>
module attributes {stable_mosaic.version = 11 : i64} {
  func.func @_mlp_kernel_resident(%arg0: i32, %arg1: memref<16x16xbf16, #tpu.memory_space<vmem>>, %arg2: memref<16x32xbf16, #tpu.memory_space<vmem>>, %arg3: memref<1x32xf32, #tpu.memory_space<vmem>>, %arg4: memref<32x128xbf16, #tpu.memory_space<vmem>>, %arg5: memref<1x128xf32, #tpu.memory_space<vmem>>, %arg6: memref<16x128xf32, #tpu.memory_space<vmem>>) attributes {dimension_semantics = [#tpu.dimension_semantics<parallel>], iteration_bounds = array<i64: 1>, scalar_prefetch = 0 : i64, scratch_operands = 0 : i64, tpu.core_type = #tpu.core_type<tc>, window_params = [{transform_indices = @transform_0, window_bounds = array<i64: 16, 16>}, {pipeline_mode = #tpu.pipeline_mode<synchronous>, transform_indices = @transform_1, window_bounds = array<i64: 16, 32>}, {pipeline_mode = #tpu.pipeline_mode<synchronous>, transform_indices = @transform_2, window_bounds = array<i64: 1, 32>}, {pipeline_mode = #tpu.pipeline_mode<synchronous>, transform_indices = @transform_3, window_bounds = array<i64: 32, 128>}, {pipeline_mode = #tpu.pipeline_mode<synchronous>, transform_indices = @transform_4, window_bounds = array<i64: 1, 128>}, {transform_indices = @transform_5, window_bounds = array<i64: 16, 128>}]} {
    %c0 = arith.constant 0 : index
    %c0_0 = arith.constant 0 : index
    %0 = vector.load %arg1[%c0, %c0_0] : memref<16x16xbf16, #tpu.memory_space<vmem>>, vector<16x16xbf16>
    %c0_1 = arith.constant 0 : index
    %c0_2 = arith.constant 0 : index
    %1 = vector.load %arg2[%c0_1, %c0_2] : memref<16x32xbf16, #tpu.memory_space<vmem>>, vector<16x32xbf16>
    %cst = arith.constant dense<0.000000e+00> : vector<16x32xf32>
    %2 = tpu.matmul %0, %1, %cst {dimension_numbers = #tpu.dot_dimension_numbers<[1], [0], [0], [1], [0, 0, 1, 1], [], []>} : vector<16x16xbf16>, vector<16x32xbf16>, vector<16x32xf32> -> vector<16x32xf32>
    %c0_3 = arith.constant 0 : index
    %c0_4 = arith.constant 0 : index
    %3 = vector.load %arg3[%c0_3, %c0_4] : memref<1x32xf32, #tpu.memory_space<vmem>>, vector<1x32xf32>
    %4 = vector.broadcast %3 : vector<1x32xf32> to vector<16x32xf32>
    %5 = arith.addf %2, %4 : vector<16x32xf32>
    %cst_5 = arith.constant 5.000000e-01 : f32
    %6 = vector.broadcast %cst_5 : f32 to vector<16x32xf32>
    %7 = arith.mulf %6, %5 : vector<16x32xf32>
    %cst_6 = arith.constant 4.471500e-02 : f32
    %8 = vector.broadcast %cst_6 : f32 to vector<16x32xf32>
    %9 = arith.mulf %8, %5 : vector<16x32xf32>
    %10 = arith.mulf %9, %5 : vector<16x32xf32>
    %11 = arith.mulf %10, %5 : vector<16x32xf32>
    %12 = arith.addf %5, %11 : vector<16x32xf32>
    %cst_7 = arith.constant 0.797884583 : f32
    %13 = vector.broadcast %cst_7 : f32 to vector<16x32xf32>
    %14 = arith.mulf %13, %12 : vector<16x32xf32>
    %15 = math.tanh %14 : vector<16x32xf32>
    %cst_8 = arith.constant 1.000000e+00 : f32
    %16 = vector.broadcast %cst_8 : f32 to vector<16x32xf32>
    %17 = arith.addf %16, %15 : vector<16x32xf32>
    %18 = arith.mulf %7, %17 : vector<16x32xf32>
    %19 = arith.truncf %18 : vector<16x32xf32> to vector<16x32xbf16>
    %c0_9 = arith.constant 0 : index
    %c0_10 = arith.constant 0 : index
    %20 = vector.load %arg4[%c0_9, %c0_10] : memref<32x128xbf16, #tpu.memory_space<vmem>>, vector<32x128xbf16>
    %cst_11 = arith.constant dense<0.000000e+00> : vector<16x128xf32>
    %21 = tpu.matmul %19, %20, %cst_11 {dimension_numbers = #tpu.dot_dimension_numbers<[1], [0], [0], [1], [0, 0, 1, 1], [], []>} : vector<16x32xbf16>, vector<32x128xbf16>, vector<16x128xf32> -> vector<16x128xf32>
    %c0_12 = arith.constant 0 : index
    %c0_13 = arith.constant 0 : index
    %22 = vector.load %arg5[%c0_12, %c0_13] : memref<1x128xf32, #tpu.memory_space<vmem>>, vector<1x128xf32>
    %23 = vector.broadcast %22 : vector<1x128xf32> to vector<16x128xf32>
    %24 = arith.addf %21, %23 : vector<16x128xf32>
    %c0_14 = arith.constant 0 : index
    %c0_15 = arith.constant 0 : index
    %25 = vector.load %arg6[%c0_14, %c0_15] : memref<16x128xf32, #tpu.memory_space<vmem>>, vector<16x128xf32>
    tpu.vector_store %arg6[%c0_14, %c0_15], %24 {strides = array<i32>} : memref<16x128xf32, #tpu.memory_space<vmem>>, vector<16x128xf32>,
    return
  }
  func.func @transform_0(%arg0: i32) -> (i32, i32) {
    %c0_i32 = arith.constant 0 : i32
    %c0_i32_0 = arith.constant 0 : i32
    return %arg0, %c0_i32 : i32, i32
  }
  func.func @transform_1(%arg0: i32) -> (i32, i32) {
    %c0_i32 = arith.constant 0 : i32
    %c0_i32_0 = arith.constant 0 : i32
    %c0_i32_1 = arith.constant 0 : i32
    return %c0_i32, %c0_i32_0 : i32, i32
  }
  func.func @transform_2(%arg0: i32) -> (i32, i32) {
    %c0_i32 = arith.constant 0 : i32
    %c0_i32_0 = arith.constant 0 : i32
    %c0_i32_1 = arith.constant 0 : i32
    return %c0_i32, %c0_i32_0 : i32, i32
  }
  func.func @transform_3(%arg0: i32) -> (i32, i32) {
    %c0_i32 = arith.constant 0 : i32
    %c0_i32_0 = arith.constant 0 : i32
    %c0_i32_1 = arith.constant 0 : i32
    return %c0_i32, %c0_i32_0 : i32, i32
  }
  func.func @transform_4(%arg0: i32) -> (i32, i32) {
    %c0_i32 = arith.constant 0 : i32
    %c0_i32_0 = arith.constant 0 : i32
    %c0_i32_1 = arith.constant 0 : i32
    return %c0_i32, %c0_i32_0 : i32, i32
  }
  func.func @transform_5(%arg0: i32) -> (i32, i32) {
    %c0_i32 = arith.constant 0 : i32
    %c0_i32_0 = arith.constant 0 : i32
    return %arg0, %c0_i32 : i32, i32
  }
}

</mosaic_0001>

<bundles_post_ra>
// kernel: tpu_custom_call.1
= control target key start
LH: loop header
LB: loop body
LE: loop exit
PB: predicated region body
PF: predicated region fallthrough
CT: control target
= control target key end

     0   :  { %10 = vsyncpa [#allocation3], 0  ;;  %s486_s0 = inlined_call_operand.hbm [shape: bf16[16,16], index: 0, kind: input, shape index: {}]   ;;  %s487_s1 = inlined_call_operand.hbm [shape: bf16[16,32], index: 1, kind: input, shape index: {}]   ;;  %s488_s2 = inlined_call_operand.vmem [shape: f32[1,32], index: 2, kind: input, shape index: {}]   ;;  %s489_s3 = inlined_call_operand.hbm [shape: bf16[32,128], index: 3, kind: input, shape index: {}]   ;;  %s490_s4 = inlined_call_operand.vmem [shape: f32[1,128], index: 4, kind: input, shape index: {}]   ;;  %s491_s5 = inlined_call_operand.hbm [shape: f32[16,128], index: 5, kind: output, shape index: {}]  }
   0x1   :  { %11 = vsyncpa [#allocation6], 0 }
   0x2   :  { %12 = vsyncpa [#allocation4], 0  ;;  %s376_s18 = smov [#allocation5]   ;;  %s377_s20 = smov [#allocation2]  }
   0x3   :  { %s30_s19 = sshll.u32 %s376_s18, 4  ;;  %s18_s21 = sshll.u32 %s377_s20, 4  ;;  %s31_s19 = int_to_ptr.vmem [resolvable:$true] %s30_s19  ;;  %s416_s21 = int_to_ptr.vmem [resolvable:$true] %s18_s21 }
   0x4   :  { %s282_s24 = scalar_lea.hbm %s487_s1, 128 }
   0x5   :  { %p283_p0 = scmp.ne.s32.totalorder %s487_s1, %s282_s24  ;;  %p286_p1 = scmp.lt.u32.totalorder %s282_s24, %s487_s1 }
   0x7   :  { %p288_p2 = pnand %p286_p1, %p283_p0 }
   0x9   :  { %291 = shalt.err (!%p288_p2)
}
   0xa   :  { %s292_s29 = scalar_lea.vmem %s31_s19, 128  ;;  %p297_p4 = scmp.lt.s32.totalorder %s31_s19, %s31_s19 }
   0xb   :  { %p293_p3 = scmp.ne.s32.totalorder %s31_s19, %s292_s29  ;;  %p298_p5 = scmp.lt.s32.totalorder %s292_s29, %s292_s29 }
   0xd   :  { %p299_p6 = por %p298_p5, %p297_p4 }
   0xf   :  { %p300_p7 = pnand %p299_p6, %p293_p3 }
  0x11   :  { %303 = shalt.err (!%p300_p7)
}
  0x12   :  { %s378_s30 = smov 64   ;;  %s379_s6 = smov 4  }
  0x13   :  { %36 = dma.hbm_to_vmem [thread:$0]  %s487_s1, 128, %s31_s19, [#allocation6], %s378_s30, %s378_s30, %s379_s6  }
  0x14   :  { %s304_s11 = scalar_lea.hbm %s486_s0, 128 }
  0x15   :  { %p305_p8 = scmp.ne.s32.totalorder %s486_s0, %s304_s11  ;;  %p308_p9 = scmp.lt.u32.totalorder %s304_s11, %s486_s0 }
  0x17   :  { %p310_p10 = pnand %p308_p9, %p305_p8 }
  0x19   :  { %313 = shalt.err (!%p310_p10)
}
  0x1a   :  { %s314_s16 = scalar_lea.vmem %s416_s21, 128  ;;  %p319_p12 = scmp.lt.s32.totalorder %s416_s21, %s416_s21 }
  0x1b   :  { %p315_p11 = scmp.ne.s32.totalorder %s416_s21, %s314_s16  ;;  %p320_p13 = scmp.lt.s32.totalorder %s314_s16, %s314_s16 }
  0x1d   :  { %p321_p0 = por %p320_p13, %p319_p12 }
  0x1f   :  { %p322_p1 = pnand %p321_p0, %p315_p11 }
  0x21   :  { %325 = shalt.err (!%p322_p1)
}
  0x22   :  { %24 = dma.hbm_to_vmem [thread:$0]  %s486_s0, 128, %s416_s21, [#allocation3], %s378_s30, %s378_s30, %s379_s6  }
  0x23   :  { %s380_s18 = smov [#allocation7]   ;;  %s326_s23 = scalar_lea.hbm %s489_s3, 256 }
  0x24   :  { %s44_s19 = sshll.u32 %s380_s18, 4  ;;  %p327_p2 = scmp.ne.s32.totalorder %s489_s3, %s326_s23  ;;  %s45_s19 = int_to_ptr.vmem [resolvable:$true] %s44_s19 }
  0x25   :  { %p330_p3 = scmp.lt.u32.totalorder %s326_s23, %s489_s3 }
  0x27   :  { %p332_p4 = pnand %p330_p3, %p327_p2 }
  0x29   :  { %335 = shalt.err (!%p332_p4)
}
  0x2a   :  { %s336_s28 = scalar_lea.vmem %s45_s19, 256  ;;  %p341_p6 = scmp.lt.s32.totalorder %s45_s19, %s45_s19 }
  0x2b   :  { %p337_p5 = scmp.ne.s32.totalorder %s45_s19, %s336_s28  ;;  %p342_p7 = scmp.lt.s32.totalorder %s336_s28, %s336_s28 }
  0x2d   :  { %p343_p8 = por %p342_p7, %p341_p6 }
  0x2f   :  { %p344_p9 = pnand %p343_p8, %p337_p5 }
  0x31   :  { %347 = shalt.err (!%p344_p9)
}
  0x32   :  { %50 = dma.hbm_to_vmem [thread:$0]  %s489_s3, 256, %s45_s19, [#allocation6], %s378_s30, %s378_s30, %s379_s6  }
  0x33   :  { %370 = dma.done.wait [#allocation3], 128  }
  0x34   :  { %371 = vsyncadd [#allocation3], 4294967168 }
  0x35   :  { %372 = dma.done.wait [#allocation6], 384  }
  0x36   :  { %373 = vsyncadd [#allocation6], 4294966912  ;;  %v381_v0 = vmov 0.0   ;;  %vm382_vm0 = vmmov 0   ;;  %v274_v1 = vld [vmem:[#allocation5] sm:$0xff]   ;;  %v275_v2 = vld [vmem:[#allocation2] sm:$0xff]  }
  0x37   :  { %250 = vmatprep.subr.bf16.mxu0 %v381_v0  ;;  %252 = vmatprep.mubr.msk.bf16.mxu0 %vm382_vm0, %v381_v0  ;;  %vm85_vm1 = vcmask 130048   ;;  %v276_v3 = vld [vmem:[#allocation7] sm:$0xff]   ;;  %v277_v4 = vld [vmem:[#allocation7 + $0x8] sm:$0xff]   ;;  %v237_v5 = vld [vmem:[%s488_s2] ss:$0 sm:$0xff]  ;;  %vm172_vm2 = vcmask 261120  }
  0x38   :  { %256 = vmatprep.subr.bf16.mxu1 %v381_v0  ;;  %260 = vmatprep.mubr.msk.bf16.mxu1 %vm382_vm0, %v381_v0  ;;  %v241_v31 = vld [vmem:[%s490_s4] ss:$0 sm:$0xff]  ;;  %s383_s6 = smov [#allocation8]  }
  0x39   :  { %251 = vmatpush3.bf16.msra.mxu0 %v274_v1  ;;  %257 = vmatpush3.bf16.msra.mxu1 %v276_v3  ;;  %s224_s7 = sshll.u32 %s383_s6, 4  ;;  %s225_s7 = int_to_ptr.vmem [resolvable:$true] %s224_s7 }
  0x3a   :  { %258 = vmatprep.subr.bf16.mxu1 %v381_v0  ;;  %s348_s8 = scalar_lea.vmem %s225_s7, 256  ;;  %p353_p11 = scmp.lt.s32.totalorder %s225_s7, %s225_s7 }
  0x3b   :  { %p349_p10 = scmp.ne.s32.totalorder %s225_s7, %s348_s8  ;;  %p354_p12 = scmp.lt.s32.totalorder %s348_s8, %s348_s8 }
  0x3c   :  { %253 = vmatmul.mubr.msk.bf16.vlgmr.msra.gmra.mrb[0].mxu0 %vm85_vm1, %v275_v2 }
  0x3d   :  { %259 = vmatpush3.bf16.msra.mxu1 %v277_v4  ;;  %p355_p13 = por %p354_p12, %p353_p11 }
  0x3f   :  { %p356_p0 = pnand %p355_p13, %p349_p10 }
 0x10f   :  { %v123_v6 = vpop.f32.mrb[0].mxu0 }
 0x110   :  { %v124_v7 = vadd.f32 %v237_v5, %v123_v6  ;;  %v254_v8 = vpop.f32.mrb[1].mxu0 }
 0x111   :  { %v126_v9 = vpop.f32.mrb[2].mxu0 }
 0x112   :  { %v132_v10 = vmul.f32 0.044715, %v124_v7  ;;  %v127_v11 = vadd.f32 %v237_v5, %v126_v9  ;;  %v255_v12 = vpop.f32.mrb[3].mxu0  ;;  %v130_v25 = vmul.f32 0.5, %v124_v7 }
 0x114   :  { %v134_v13 = vmul.f32 %v132_v10, %v124_v7  ;;  %v133_v14 = vmul.f32 0.044715, %v127_v11  ;;  %v131_v26 = vmul.f32 0.5, %v127_v11 }
 0x116   :  { %v136_v15 = vmul.f32 %v134_v13, %v124_v7  ;;  %v135_v16 = vmul.f32 %v133_v14, %v127_v11 }
 0x118   :  { %v138_v17 = vadd.f32 %v136_v15, %v124_v7  ;;  %v137_v18 = vmul.f32 %v135_v16, %v127_v11 }
 0x11a   :  { %v140_v19 = vmul.f32 0.7978846, %v138_v17  ;;  %v139_v20 = vadd.f32 %v137_v18, %v127_v11 }
 0x11c   :  { %278 = vtanh.f32 %v140_v19  ;;  %v141_v21 = vmul.f32 0.7978846, %v139_v20 }
 0x11e   :  { %280 = vtanh.f32 %v141_v21 }
 0x126   :  { %v279_v22 = vpop.eup %278 }
 0x127   :  { %v144_v23 = vadd.f32 1.0, %v279_v22 }
 0x128   :  { %v281_v24 = vpop.eup %280 }
 0x129   :  { %v145_v27 = vadd.f32 1.0, %v281_v24  ;;  %v146_v28 = vmul.f32 %v144_v23, %v130_v25 }
 0x12b   :  { %v147_v29 = vmul.f32 %v145_v27, %v131_v26 }
 0x12d   :  { %v148_v30 = vpack.c.bf16 %v147_v29, %v146_v28 }
 0x12f   :  { %261 = vmatmul.mubr.msk.bf16.vlgmr.msra.gmra.mrb[0].mxu1 %vm172_vm2, %v148_v30 }
 0x202   :  { %v210_v32 = vpop.f32.mrb[0].mxu1 }
 0x203   :  { %v211_v33 = vadd.f32 %v241_v31, %v210_v32  ;;  %v262_v34 = vpop.f32.mrb[1].mxu1 }
 0x204   :  { %v213_v35 = vpop.f32.mrb[2].mxu1 }
 0x205   :  { %217 = vst [vmem:[#allocation8] sm:$0xff] %v211_v33  ;;  %v214_v36 = vadd.f32 %v241_v31, %v213_v35  ;;  %v263_v37 = vpop.f32.mrb[3].mxu1 }
 0x207   :  { %218 = vst [vmem:[#allocation8 + $0x8] sm:$0xff] %v214_v36 }
 0x208   :  { %359 = shalt.err (!%p356_p0)
}
 0x209   :  { %s360_s10 = scalar_lea.hbm %s491_s5, 256 }
 0x20a   :  { %p361_p1 = scmp.ne.s32.totalorder %s491_s5, %s360_s10  ;;  %p364_p2 = scmp.lt.u32.totalorder %s360_s10, %s491_s5 }
 0x20c   :  { %p366_p3 = pnand %p364_p2, %p361_p1 }
 0x20e   :  { %369 = shalt.err (!%p366_p3)
}
 0x20f   :  { %s384_s15 = smov 128   ;;  %s385_s16 = smov 8  }
 0x210   :  { %230 = dma.vmem_to_hbm [thread:$0]  %s225_s7, 256, %s491_s5, [#allocation4], %s384_s15, %s384_s15, %s385_s16  }
 0x211   :  { %374 = dma.done.wait [#allocation4], 256  }
 0x212   :  { %375 = vsyncadd [#allocation4], 4294967040 }
 0x213   :  { %234 = vsyncpa [#allocation3], 1 }
 0x214   :  { %235 = vsyncpa [#allocation6], 1 }
 0x215   :  { %236 = vsyncpa [#allocation4], 1 }

</bundles_post_ra>
